<compile_context>
chip_gen: v7x
topology: tpu7x:2x2x1
jax: 0.10.0
libtpu: 0.0.40
codegen_flags: <defaults>
</compile_context>

<pallas_src>
import jax
import jax.numpy as jnp
from jax.experimental import pallas as pl
from jax.experimental.pallas import tpu as pltpu

BN_EPS = 1e-5
LANE = 128
NEG_BIG = -1e30


def mlp_kernel(x_ref, w1_ref, b1_ref, w2_ref, b2_ref, mask_ref, o_ref):
    # In-kernel f32 -> bf16 cast of the activations (rides idle VPU slots;
    # avoids a separate wrapper-side cast pass over HBM).
    x = x_ref[...].astype(jnp.bfloat16)

    # fc1 (BatchNorm already folded into w1/b1): bf16 MXU inputs, f32 acc.
    h = jnp.dot(x, w1_ref[...], preferred_element_type=jnp.float32) + b1_ref[...]
    # ReLU (f32 on the VPU).
    h = jnp.maximum(h, 0.0)
    # Dropout(p=0.2) -> identity in eval mode.

    # fc2 (output columns zero-padded to a full 128-lane width) + ReLU.
    y = jnp.dot(h.astype(jnp.bfloat16), w2_ref[...],
                preferred_element_type=jnp.float32) + b2_ref[...]
    y = jnp.maximum(y, 0.0)

    # Additive lane mask: 0 on real columns, -1e30 on pads -> exp() == 0.
    y = y + mask_ref[...]

    # Softmax over dim=1 (features); approx reciprocal runs on the EUP.
    m = jnp.max(y, axis=1, keepdims=True)
    e = jnp.exp(y - m)
    p = e * pl.reciprocal(jnp.sum(e, axis=1, keepdims=True), approx=True)
    o_ref[...] = p.astype(o_ref.dtype)


def _round_up(x, m):
    return ((x + m - 1) // m) * m


def fold_bn_into_fc1(w1, b1, gamma, beta, rmean, rvar, eps=BN_EPS):
    """Eval-mode BN(fc1(x)) == x @ (w1*scale) + ((b1-rmean)*scale + beta)."""
    scale = gamma * jax.lax.rsqrt(rvar + eps)          # (1, H)
    return w1 * scale, (b1 - rmean) * scale + beta


def pad_output_lanes(w2, b2, lane=LANE):
    """Zero-pad fc2 to a multiple of 128 output columns (lane-dense stores)."""
    h, o = w2.shape
    p = _round_up(o, lane)
    w2_p = jnp.zeros((h, p), w2.dtype).at[:, :o].set(w2)
    b2_p = jnp.zeros((1, p), b2.dtype).at[:, :o].set(b2)
    return w2_p, b2_p


def prepare_params(raw_params):
    """Fold BN, pad fc2, build the additive lane mask, cast weights to bf16."""
    (w1, b1, gamma, beta, rmean, rvar, w2, b2) = raw_params
    w1f, b1f = fold_bn_into_fc1(w1, b1, gamma, beta, rmean, rvar)
    w2p, b2p = pad_output_lanes(w2, b2)
    out_dim = w2.shape[1]
    p = w2p.shape[1]
    lane_mask = jnp.where(jnp.arange(p)[None, :] < out_dim,
                          0.0, NEG_BIG).astype(jnp.float32)
    return (w1f.astype(jnp.bfloat16), b1f.astype(jnp.float32),
            w2p.astype(jnp.bfloat16), b2p.astype(jnp.float32),
            lane_mask)


def _choose_tm(B, max_tm=1024):
    """Large batch tiles (amortize per-step overhead) while keeping >= 2 grid
    steps when the batch allows (v7x two-TensorCore sharding)."""
    half = _round_up(pl.cdiv(B, 2), 8)
    return max(8, min(max_tm, half))


def mlp_forward(x, prepared_params, out_dim):
    w1, b1, w2, b2, lane_mask = prepared_params
    x = x.astype(jnp.float32)            # mirrors x.type(torch.FloatTensor)
    B, d_in = x.shape
    H = w1.shape[1]
    P = w2.shape[1]                      # padded output width (multiple of 128)

    tm = _choose_tm(B)
    grid_m = pl.cdiv(B, tm)
    B_pad = grid_m * tm
    if B_pad != B:                       # pad batch instead of one giant block
        x = jnp.zeros((B_pad, d_in), x.dtype).at[:B, :].set(x)

    grid_spec = pltpu.PrefetchScalarGridSpec(
        num_scalar_prefetch=0,
        grid=(grid_m,),
        in_specs=[
            pl.BlockSpec((tm, d_in), lambda i: (i, 0)),   # activations: tiled
            pl.BlockSpec((d_in, H), lambda i: (0, 0)),    # weights: VMEM-resident
            pl.BlockSpec((1, H), lambda i: (0, 0)),
            pl.BlockSpec((H, P), lambda i: (0, 0)),
            pl.BlockSpec((1, P), lambda i: (0, 0)),
            pl.BlockSpec((1, P), lambda i: (0, 0)),       # additive lane mask
        ],
        out_specs=pl.BlockSpec((tm, P), lambda i: (i, 0)),
    )

    out_padded = pl.pallas_call(
        mlp_kernel,
        out_shape=jax.ShapeDtypeStruct((B_pad, P), jnp.bfloat16),
        grid_spec=grid_spec,
        compiler_params=pltpu.CompilerParams(
            dimension_semantics=("parallel",),
            vmem_limit_bytes=32 << 20),
    )(x, w1, b1, w2, b2, lane_mask)

    return out_padded[:B, :out_dim].astype(jnp.float32)


def init_params(key, input_size, hidden_dim, out_dim):
    k1, k2, k3, k4, k5, k6, k7, k8 = jax.random.split(key, 8)
    # fc1 / fc2 weights stored transposed: [in, out]
    w1 = jax.random.normal(k1, (input_size, hidden_dim), jnp.float32) * 0.1
    b1 = jax.random.normal(k2, (1, hidden_dim), jnp.float32) * 0.1
    w2 = jax.random.normal(k3, (hidden_dim, out_dim), jnp.float32) * 0.1
    b2 = jax.random.normal(k4, (1, out_dim), jnp.float32) * 0.1
    # BatchNorm1d affine params + non-trivial running stats (eval mode).
    gamma = 1.0 + 0.05 * jax.random.normal(k5, (1, hidden_dim), jnp.float32)
    beta = 0.05 * jax.random.normal(k6, (1, hidden_dim), jnp.float32)
    rmean = 0.1 * jax.random.normal(k7, (1, hidden_dim), jnp.float32)
    rvar = 0.5 + jax.random.uniform(k8, (1, hidden_dim), jnp.float32)
    return (w1, b1, gamma, beta, rmean, rvar, w2, b2)


def mlp_reference(x, raw_params):
    """Pure-JAX f32 reference of the eval-mode PyTorch forward pass."""
    (w1, b1, gamma, beta, rmean, rvar, w2, b2) = raw_params
    x = x.astype(jnp.float32)
    h = x @ w1 + b1
    h = (h - rmean) * gamma / jnp.sqrt(rvar + BN_EPS) + beta
    h = jnp.maximum(h, 0.0)
    y = jnp.maximum(h @ w2 + b2, 0.0)
    return jax.nn.softmax(y, axis=1)


if __name__ == "__main__":
    batch, input_size, hidden_dim, out_dim = 256, 32, 32, 8

    key = jax.random.PRNGKey(0)
    kx, kp = jax.random.split(key)
    x = jax.random.normal(kx, (batch, input_size), jnp.float32)
    raw_params = init_params(kp, input_size, hidden_dim, out_dim)
    prepared = prepare_params(raw_params)

    out = mlp_forward(x, prepared, out_dim)
    jax.block_until_ready(out)

    assert out.shape == (batch, out_dim)
    # rows of a softmax sum to 1 (loose tolerance: approx recip + bf16 output)
    assert bool(jnp.all(jnp.abs(jnp.sum(out, axis=1) - 1.0) < 1e-2))
    # matches the f32 reference within bf16/approx-recip tolerance
    ref = mlp_reference(x, raw_params)
    assert bool(jnp.max(jnp.abs(out - ref)) < 2e-2)
    print("KERNEL_OK")
</pallas_src>

<mosaic_0001>
module attributes {stable_mosaic.version = 11 : i64} {
  func.func @mlp_kernel(%arg0: i32, %arg1: memref<128x32xf32, #tpu.memory_space<vmem>>, %arg2: memref<32x32xbf16, #tpu.memory_space<vmem>>, %arg3: memref<1x32xf32, #tpu.memory_space<vmem>>, %arg4: memref<32x128xbf16, #tpu.memory_space<vmem>>, %arg5: memref<1x128xf32, #tpu.memory_space<vmem>>, %arg6: memref<1x128xf32, #tpu.memory_space<vmem>>, %arg7: memref<128x128xbf16, #tpu.memory_space<vmem>>) attributes {dimension_semantics = [#tpu.dimension_semantics<parallel>], iteration_bounds = array<i64: 2>, scalar_prefetch = 0 : i64, scratch_operands = 0 : i64, tpu.core_type = #tpu.core_type<tc>, window_params = [{transform_indices = @transform_0, window_bounds = array<i64: 128, 32>}, {pipeline_mode = #tpu.pipeline_mode<synchronous>, transform_indices = @transform_1, window_bounds = array<i64: 32, 32>}, {pipeline_mode = #tpu.pipeline_mode<synchronous>, transform_indices = @transform_2, window_bounds = array<i64: 1, 32>}, {pipeline_mode = #tpu.pipeline_mode<synchronous>, transform_indices = @transform_3, window_bounds = array<i64: 32, 128>}, {pipeline_mode = #tpu.pipeline_mode<synchronous>, transform_indices = @transform_4, window_bounds = array<i64: 1, 128>}, {pipeline_mode = #tpu.pipeline_mode<synchronous>, transform_indices = @transform_5, window_bounds = array<i64: 1, 128>}, {transform_indices = @transform_6, window_bounds = array<i64: 128, 128>}]} {
    %c0 = arith.constant 0 : index
    %c0_0 = arith.constant 0 : index
    %0 = vector.load %arg1[%c0, %c0_0] : memref<128x32xf32, #tpu.memory_space<vmem>>, vector<128x32xf32>
    %1 = arith.truncf %0 : vector<128x32xf32> to vector<128x32xbf16>
    %c0_1 = arith.constant 0 : index
    %c0_2 = arith.constant 0 : index
    %2 = vector.load %arg2[%c0_1, %c0_2] : memref<32x32xbf16, #tpu.memory_space<vmem>>, vector<32x32xbf16>
    %cst = arith.constant dense<0.000000e+00> : vector<128x32xf32>
    %3 = tpu.matmul %1, %2, %cst {dimension_numbers = #tpu.dot_dimension_numbers<[1], [0], [0], [1], [0, 0, 1, 1], [], []>} : vector<128x32xbf16>, vector<32x32xbf16>, vector<128x32xf32> -> vector<128x32xf32>
    %c0_3 = arith.constant 0 : index
    %c0_4 = arith.constant 0 : index
    %4 = vector.load %arg3[%c0_3, %c0_4] : memref<1x32xf32, #tpu.memory_space<vmem>>, vector<1x32xf32>
    %5 = vector.broadcast %4 : vector<1x32xf32> to vector<128x32xf32>
    %6 = arith.addf %3, %5 : vector<128x32xf32>
    %cst_5 = arith.constant 0.000000e+00 : f32
    %7 = vector.broadcast %cst_5 : f32 to vector<128x32xf32>
    %8 = arith.maximumf %6, %7 : vector<128x32xf32>
    %9 = arith.truncf %8 : vector<128x32xf32> to vector<128x32xbf16>
    %c0_6 = arith.constant 0 : index
    %c0_7 = arith.constant 0 : index
    %10 = vector.load %arg4[%c0_6, %c0_7] : memref<32x128xbf16, #tpu.memory_space<vmem>>, vector<32x128xbf16>
    %cst_8 = arith.constant dense<0.000000e+00> : vector<128x128xf32>
    %11 = tpu.matmul %9, %10, %cst_8 {dimension_numbers = #tpu.dot_dimension_numbers<[1], [0], [0], [1], [0, 0, 1, 1], [], []>} : vector<128x32xbf16>, vector<32x128xbf16>, vector<128x128xf32> -> vector<128x128xf32>
    %c0_9 = arith.constant 0 : index
    %c0_10 = arith.constant 0 : index
    %12 = vector.load %arg5[%c0_9, %c0_10] : memref<1x128xf32, #tpu.memory_space<vmem>>, vector<1x128xf32>
    %13 = vector.broadcast %12 : vector<1x128xf32> to vector<128x128xf32>
    %14 = arith.addf %11, %13 : vector<128x128xf32>
    %cst_11 = arith.constant 0.000000e+00 : f32
    %15 = vector.broadcast %cst_11 : f32 to vector<128x128xf32>
    %16 = arith.maximumf %14, %15 : vector<128x128xf32>
    %c0_12 = arith.constant 0 : index
    %c0_13 = arith.constant 0 : index
    %17 = vector.load %arg6[%c0_12, %c0_13] : memref<1x128xf32, #tpu.memory_space<vmem>>, vector<1x128xf32>
    %18 = vector.broadcast %17 : vector<1x128xf32> to vector<128x128xf32>
    %19 = arith.addf %16, %18 : vector<128x128xf32>
    %cst_14 = arith.constant dense<0xFF800000> : vector<128xf32>
    %20 = vector.multi_reduction <maximumf>, %19, %cst_14 [1] : vector<128x128xf32> to vector<128xf32>
    %21 = vector.shape_cast %20 : vector<128xf32> to vector<128x1xf32>
    %22 = vector.broadcast %21 : vector<128x1xf32> to vector<128x128xf32>
    %23 = arith.subf %19, %22 : vector<128x128xf32>
    %24 = math.exp %23 : vector<128x128xf32>
    %cst_15 = arith.constant dense<0.000000e+00> : vector<128xf32>
    %25 = vector.multi_reduction <add>, %24, %cst_15 [1] : vector<128x128xf32> to vector<128xf32>
    %26 = vector.shape_cast %25 : vector<128xf32> to vector<128x1xf32>
    %27 = tpu.reciprocal %26 {approx = true} : vector<128x1xf32> -> vector<128x1xf32>
    %28 = vector.broadcast %27 : vector<128x1xf32> to vector<128x128xf32>
    %29 = arith.mulf %24, %28 : vector<128x128xf32>
    %30 = arith.truncf %29 : vector<128x128xf32> to vector<128x128xbf16>
    %c0_16 = arith.constant 0 : index
    %c0_17 = arith.constant 0 : index
    %31 = vector.load %arg7[%c0_16, %c0_17] : memref<128x128xbf16, #tpu.memory_space<vmem>>, vector<128x128xbf16>
    tpu.vector_store %arg7[%c0_16, %c0_17], %30 {strides = array<i32>} : memref<128x128xbf16, #tpu.memory_space<vmem>>, vector<128x128xbf16>,
    return
  }
  func.func @transform_0(%arg0: i32) -> (i32, i32) {
    %c0_i32 = arith.constant 0 : i32
    %c0_i32_0 = arith.constant 0 : i32
    return %arg0, %c0_i32 : i32, i32
  }
  func.func @transform_1(%arg0: i32) -> (i32, i32) {
    %c0_i32 = arith.constant 0 : i32
    %c0_i32_0 = arith.constant 0 : i32
    %c0_i32_1 = arith.constant 0 : i32
    return %c0_i32, %c0_i32_0 : i32, i32
  }
  func.func @transform_2(%arg0: i32) -> (i32, i32) {
    %c0_i32 = arith.constant 0 : i32
    %c0_i32_0 = arith.constant 0 : i32
    %c0_i32_1 = arith.constant 0 : i32
    return %c0_i32, %c0_i32_0 : i32, i32
  }
  func.func @transform_3(%arg0: i32) -> (i32, i32) {
    %c0_i32 = arith.constant 0 : i32
    %c0_i32_0 = arith.constant 0 : i32
    %c0_i32_1 = arith.constant 0 : i32
    return %c0_i32, %c0_i32_0 : i32, i32
  }
  func.func @transform_4(%arg0: i32) -> (i32, i32) {
    %c0_i32 = arith.constant 0 : i32
    %c0_i32_0 = arith.constant 0 : i32
    %c0_i32_1 = arith.constant 0 : i32
    return %c0_i32, %c0_i32_0 : i32, i32
  }
  func.func @transform_5(%arg0: i32) -> (i32, i32) {
    %c0_i32 = arith.constant 0 : i32
    %c0_i32_0 = arith.constant 0 : i32
    %c0_i32_1 = arith.constant 0 : i32
    return %c0_i32, %c0_i32_0 : i32, i32
  }
  func.func @transform_6(%arg0: i32) -> (i32, i32) {
    %c0_i32 = arith.constant 0 : i32
    %c0_i32_0 = arith.constant 0 : i32
    return %arg0, %c0_i32 : i32, i32
  }
}

</mosaic_0001>

<bundles_post_ra>
// kernel: tpu_custom_call.1
= control target key start
LH: loop header
LB: loop body
LE: loop exit
PB: predicated region body
PF: predicated region fallthrough
CT: control target
= control target key end

     0   :  { %11 = vsyncpa [#allocation3], 0  ;;  %s1652_s0 = inlined_call_operand.vmem [shape: f32[256,32], index: 0, kind: input, shape index: {}]   ;;  %s1653_s1 = inlined_call_operand.vmem [shape: bf16[32,32], index: 1, kind: input, shape index: {}]   ;;  %s1654_s2 = inlined_call_operand.vmem [shape: f32[1,32], index: 2, kind: input, shape index: {}]   ;;  %s1655_s3 = inlined_call_operand.vmem [shape: bf16[32,128], index: 3, kind: input, shape index: {}]   ;;  %s1656_s4 = inlined_call_operand.vmem [shape: f32[1,128], index: 4, kind: input, shape index: {}]   ;;  %s1657_s5 = inlined_call_operand.vmem [shape: f32[1,128], index: 5, kind: input, shape index: {}]   ;;  %s1658_s6 = inlined_call_operand.hbm [shape: bf16[256,128], index: 6, kind: output, shape index: {}]  }
   0x1   :  { %13 = vsyncpa [#allocation3 + $0x1], 0  ;;  %s1316_s21 = smov 0   ;;  %s1318_s22 = smov 0  }
   0x2   :  { %s1320_s23 = smov 0   ;;  %s1322_s24 = smov 0  }
   0x3 LB: > { %s1337_s25 = sadd.s32 4294967295, %s1276_s24   ;;  %s930_s26 = sadd.s32 4294967294, %s1276_s24   ;;  %s1276_s24 = sphi %s1322_s24, %s1664_s24   ;;  %s1272_s23 = sphi %s1320_s23, %s1663_s23   ;;  %s1268_s22 = sphi %s1318_s22, %s1662_s22   ;;  %s1264_s21 = sphi %s1316_s21, %s1661_s21  }
   0x4   : > { %s1341_s27 = sadd.s32 1, %s1276_s24   ;;  %s157_s28 = sadd.s32 1, %s1272_s23 }
   0x5   : > { %s154_s29 = ssub.s32 %s1276_s24, %s1341_s27  ;;  %p167_p0 = scmp.ne.s32.totalorder %s1272_s23, %s1268_s22 }
   0x6   : > { %p155_p1 = scmp.eq.s32.totalorder %s154_s29, 0  ;;  %p168_p2 = scmp.eq.s32.totalorder %s1337_s25, 1 }
   0x7   : > { %p173_p3 = scmp.ne.s32.totalorder %s1268_s22, %s1264_s21  ;;  %p174_p4 = scmp.eq.s32.totalorder %s930_s26, 1 }
   0x8   : > { %s1352_s30 = scalar_select %p155_p1, %s1272_s23, %s157_s28  }
   0x9   : > { %p1354_p5 = por %p168_p2, %p167_p0  ;;  %p1358_p6 = por %p174_p4, %p173_p3 }
   0xa   : > { %p933_p7 = scmp.ge.s32.totalorder %s1276_s24, 1  ;;  %p216_p8 = scmp.lt.s32.totalorder %s1276_s24, 3 }
   0xc   : > { %p217_p9 = pnand %p933_p7, %p216_p8 }
   0xd   : > { %v1146_v0 = vld [vmem:[%s1653_s1] sm:$0xff] (!%p217_p9)   ;;  %s935_s11 = sshll.u32 (!%p217_p9), %s1337_s25, 4  ;;  %v1147_v1 = vld [vmem:[%s1653_s1 + $0x8] sm:$0xff] (!%p217_p9)   ;;  %vm301_vm0 = vcmask (!%p217_p9), 261120   ;;  %s243_s13 = sand.u32 (!%p217_p9), 1, %s1268_s22  }
   0xe   : > { %220 = sbr.rel (%p217_p9) target bundleno = 829 (0x33d), region = 44  ;;  %p247_p10 = scmp.lt.s32.totalorder (!%p217_p9), %s935_s11, 31  ;;  %1065 = vmatprep.subr.bf16.mxu0 (!%p217_p9), %v1146_v0  ;;  %v1148_v26 = vld [vmem:[%s1655_s3] sm:$0xff] (!%p217_p9)   ;;  %v1149_v27 = vld [vmem:[%s1655_s3 + $0x8] sm:$0xff] (!%p217_p9)  }
   0xf   : > { %1066 = vmatpush3.bf16.msra.mxu0 (!%p217_p9), %v1146_v0  ;;  %1085 = vmatprep.subr.bf16.mxu1 (!%p217_p9), %v1148_v26  ;;  %v937_v28 = vld [vmem:[%s1654_s2] ss:$0 sm:$0xff] (!%p217_p9)  ;;  %s997_s16 = sshll.u32 (!%p217_p9), %s1337_s25, 10  ;;  %s1611_s25 = scalar_lea.sflag (!%p217_p9), [#allocation3], %s243_s13 }
  0x10   : > { %1067 = vmatprep.subr.bf16.mxu0 (!%p217_p9), %v1147_v1  ;;  %1086 = vmatpush3.bf16.msra.mxu1 (!%p217_p9), %v1148_v26  ;;  %s1604_s20 = scalar_lea.hbm (!%p217_p9), %s1658_s6, %s997_s16  ;;  %s1278_s28 = smov (!%p217_p9), [#allocation2]  }
  0x11   : > { %1087 = vmatprep.subr.bf16.mxu1 (!%p217_p9), %v1149_v27  ;;  %s1218_s29 = sshll.u32 (!%p217_p9), %s1278_s28, 4  ;;  %s1219_s29 = int_to_ptr.vmem [resolvable:$false] %s1218_s29 }
  0x12   : > { %s1220_s9 = scalar_lea.vmem (!%p217_p9), %s1219_s29, 2048 }
  0x13   : > { %1068 = vmatpush3.bf16.msra.mxu0 (!%p217_p9), %v1147_v1 }
  0x14   : > { %1088 = vmatpush3.bf16.msra.mxu1 (!%p217_p9), %v1149_v27  ;;  %v1427_v27 = vld [vmem:[%s1657_s5] ss:$0 sm:$0xff] (!%p217_p9) }
  0x15   : > { %s1666_s11 = smov (!%p247_p10, %s935_s11), 31 }
  0x16   : > { %s936_s14 = sshll.u32 %s1666_s11, 3 }
  0x17   : > { %s1374_s17 = scalar_lea.vmem %s1652_s0, %s936_s14  ;;  %s934_s14 = sshll.u32 %s243_s13, 6 }
  0x18   : > { %v254_v2 = vld [vmem:[%s1374_s17] sm:$0xff]  ;;  %v255_v3 = vld [vmem:[%s1374_s17 + $0x8] sm:$0xff]  ;;  %v256_v4 = vld [vmem:[%s1374_s17 + $0x10] sm:$0xff]  ;;  %s1576_s15 = scalar_lea.vmem [#allocation2], %s934_s14 }
  0x19   : > { %v270_v5 = vpack.c.bf16 %v255_v3, %v254_v2  ;;  %v257_v6 = vld [vmem:[%s1374_s17 + $0x18] sm:$0xff]  ;;  %v258_v7 = vld [vmem:[%s1374_s17 + $0x20] sm:$0xff]  ;;  %v259_v8 = vld [vmem:[%s1374_s17 + $0x28] sm:$0xff] }
  0x1a   : > { %v271_v9 = vpack.c.bf16 %v257_v6, %v256_v4  ;;  %v272_v10 = vpack.c.bf16 %v259_v8, %v258_v7  ;;  %v260_v11 = vld [vmem:[%s1374_s17 + $0x30] sm:$0xff]  ;;  %v261_v12 = vld [vmem:[%s1374_s17 + $0x38] sm:$0xff]  ;;  %v262_v13 = vld [vmem:[%s1374_s17 + $0x40] sm:$0xff] }
  0x1b   : > { %1069 = vmatprep.mubr.msk.bf16.mxu0 %vm301_vm0, %v270_v5  ;;  %v263_v14 = vld [vmem:[%s1374_s17 + $0x48] sm:$0xff]  ;;  %v273_v15 = vpack.c.bf16 %v261_v12, %v260_v11  ;;  %v264_v17 = vld [vmem:[%s1374_s17 + $0x50] sm:$0xff]  ;;  %v265_v18 = vld [vmem:[%s1374_s17 + $0x58] sm:$0xff] }
  0x1c   : > { %1070 = vmatmul.mubr.msk.bf16.vlgmr.msra.gmra.mrb[0].mxu0 %vm301_vm0, %v271_v9  ;;  %v274_v16 = vpack.c.bf16 %v263_v14, %v262_v13  ;;  %v266_v19 = vld [vmem:[%s1374_s17 + $0x60] sm:$0xff]  ;;  %v267_v20 = vld [vmem:[%s1374_s17 + $0x68] sm:$0xff]  ;;  %v275_v21 = vpack.c.bf16 %v265_v18, %v264_v17  ;;  %v268_v23 = vld [vmem:[%s1374_s17 + $0x70] sm:$0xff] }
  0x1d   : > { %1073 = vmatprep.mubr.msk.bf16.mxu0 %vm301_vm0, %v272_v10  ;;  %v276_v22 = vpack.c.bf16 %v267_v20, %v266_v19  ;;  %v269_v24 = vld [vmem:[%s1374_s17 + $0x78] sm:$0xff]  ;;  %s868_s17 = sshll.u32 %s1576_s15, 4  ;;  %s1606_s17 = int_to_ptr.vmem [resolvable:$true] %s868_s17 }
  0x1e   : > { %v277_v25 = vpack.c.bf16 %v269_v24, %v268_v23  ;;  %s1214_s26 = scalar_lea.vmem %s1606_s17, 1024  ;;  %p1221_p0 = scmp.lt.s32.totalorder %s1606_s17, %s1219_s29 }
  0x1f   : > { %p1215_p11 = scmp.ne.s32.totalorder %s1606_s17, %s1214_s26  ;;  %p1222_p1 = scmp.lt.s32.totalorder %s1220_s9, %s1214_s26 }
  0x21   : > { %p1216_p12 = pnand %p1215_p11, %p1354_p5  ;;  %p1223_p2 = por %p1222_p1, %p1221_p0 }
  0x23   : > { %p1217_p13 = pneg %p1216_p12 }
  0x24   : > { %1074 = vmatmul.mubr.msk.bf16.gmra.mrb[4].mxu0 %vm301_vm0, %v273_v15 }
  0x25   : > { %1077 = vmatprep.mubr.msk.bf16.mxu0 %vm301_vm0, %v274_v16  ;;  %p1224_p3 = pnand %p1223_p2, %p1217_p13 }
  0x2c   : > { %1078 = vmatmul.mubr.msk.bf16.gmra.mrb[8].mxu0 %vm301_vm0, %v275_v21  ;;  %v1420_v21 = vld [vmem:[%s1656_s4] ss:$0 sm:$0xff] }
  0x2d   : > { %1081 = vmatprep.mubr.msk.bf16.mxu0 %vm301_vm0, %v276_v22 }
  0x34   : > { %1082 = vmatmul.mubr.msk.bf16.gmra.mrb[12].mxu0 %vm301_vm0, %v277_v25 }
  0xef   : > { %v1071_v29 = vpop.f32.mrb[0].mxu0 }
  0xf0   : > { %v369_v30 = vadd.f32 %v1071_v29, %v937_v28  ;;  %v360_v31 = vpop.f32.mrb[1].mxu0 }
  0xf1   : > { %v361_v32 = vadd.f32 %v937_v28, %v360_v31  ;;  %v1072_v33 = vpop.f32.mrb[2].mxu0 }
  0xf2   : > { %v372_v34 = vadd.f32 %v1072_v33, %v937_v28  ;;  %v363_v35 = vpop.f32.mrb[3].mxu0  ;;  %v425_v37 = vmax.f32 %v369_v30, 0.0 }
  0xf3   : > { %v364_v36 = vadd.f32 %v937_v28, %v363_v35  ;;  %v423_v39 = vmax.f32 %v361_v32, 0.0 }
  0xf4   : > { %v426_v38 = vmax.f32 %v372_v34, 0.0 }
  0xf5   : > { %v424_v40 = vmax.f32 %v364_v36, 0.0 }
  0xf6   : > { %v440_v41 = vpack.c.bf16 %v426_v38, %v425_v37 }
  0xf7   : > { %v1075_v42 = vpop.f32.mrb[4].mxu0  ;;  %v439_v43 = vpack.c.bf16 %v424_v40, %v423_v39 }
  0xf8   : > { %v385_v44 = vadd.f32 %v1075_v42, %v937_v28  ;;  %v376_v45 = vpop.f32.mrb[5].mxu0 }
  0xf9   : > { %v377_v46 = vadd.f32 %v937_v28, %v376_v45  ;;  %v1076_v47 = vpop.f32.mrb[6].mxu0  ;;  %1089 = vmatprep.mubr.msk.bf16.mxu1 %vm301_vm0, %v439_v43 }
  0xfa   : > { %v429_v48 = vmax.f32 %v385_v44, 0.0  ;;  %v388_v49 = vadd.f32 %v1076_v47, %v937_v28  ;;  %v379_v50 = vpop.f32.mrb[7].mxu0  ;;  %1090 = vmatmul.mubr.msk.bf16.vlgmr.msra.gmra.mrb[0].mxu1 %vm301_vm0, %v440_v41 }
  0xfb   : > { %v380_v51 = vadd.f32 %v937_v28, %v379_v50  ;;  %v427_v53 = vmax.f32 %v377_v46, 0.0 }
  0xfc   : > { %v430_v52 = vmax.f32 %v388_v49, 0.0 }
  0xfd   : > { %v428_v54 = vmax.f32 %v380_v51, 0.0 }
  0xfe   : > { %v442_v55 = vpack.c.bf16 %v430_v52, %v429_v48 }
  0xff   : > { %v441_v56 = vpack.c.bf16 %v428_v54, %v427_v53  ;;  %v1079_v57 = vpop.f32.mrb[8].mxu0 }
 0x100   : > { %v401_v58 = vadd.f32 %v1079_v57, %v937_v28  ;;  %v392_v59 = vpop.f32.mrb[9].mxu0 }
 0x101   : > { %v393_v60 = vadd.f32 %v937_v28, %v392_v59  ;;  %v1080_v61 = vpop.f32.mrb[10].mxu0  ;;  %1093 = vmatprep.mubr.msk.bf16.mxu1 %vm301_vm0, %v441_v56 }
 0x102   : > { %v433_v62 = vmax.f32 %v401_v58, 0.0  ;;  %v404_v63 = vadd.f32 %v1080_v61, %v937_v28  ;;  %v395_v0 = vpop.f32.mrb[11].mxu0  ;;  %1094 = vmatmul.mubr.msk.bf16.gmra.mrb[4].mxu1 %vm301_vm0, %v442_v55 }
 0x103   : > { %v396_v1 = vadd.f32 %v937_v28, %v395_v0  ;;  %v431_v3 = vmax.f32 %v393_v60, 0.0 }
 0x104   : > { %v434_v2 = vmax.f32 %v404_v63, 0.0 }
 0x105   : > { %v432_v4 = vmax.f32 %v396_v1, 0.0 }
 0x106   : > { %v444_v5 = vpack.c.bf16 %v434_v2, %v433_v62 }
 0x107   : > { %v443_v6 = vpack.c.bf16 %v432_v4, %v431_v3  ;;  %v1083_v7 = vpop.f32.mrb[12].mxu0 }
 0x108   : > { %v417_v8 = vadd.f32 %v1083_v7, %v937_v28  ;;  %v408_v9 = vpop.f32.mrb[13].mxu0 }
 0x109   : > { %v409_v10 = vadd.f32 %v937_v28, %v408_v9  ;;  %v1084_v11 = vpop.f32.mrb[14].mxu0  ;;  %1097 = vmatprep.mubr.msk.bf16.mxu1 %vm301_vm0, %v443_v6 }
 0x10a   : > { %v437_v12 = vmax.f32 %v417_v8, 0.0  ;;  %v420_v13 = vadd.f32 %v1084_v11, %v937_v28  ;;  %v411_v14 = vpop.f32.mrb[15].mxu0  ;;  %1098 = vmatmul.mubr.msk.bf16.gmra.mrb[8].mxu1 %vm301_vm0, %v444_v5 }
 0x10b   : > { %v412_v15 = vadd.f32 %v937_v28, %v411_v14  ;;  %v435_v17 = vmax.f32 %v409_v10, 0.0 }
 0x10c   : > { %v438_v16 = vmax.f32 %v420_v13, 0.0 }
 0x10d   : > { %v436_v18 = vmax.f32 %v412_v15, 0.0 }
 0x10e   : > { %v446_v19 = vpack.c.bf16 %v438_v16, %v437_v12 }
 0x10f   : > { %v445_v20 = vpack.c.bf16 %v436_v18, %v435_v17 }
 0x111   : > { %1101 = vmatprep.mubr.msk.bf16.mxu1 %vm301_vm0, %v445_v20 }
 0x112   : > { %1102 = vmatmul.mubr.msk.bf16.gmra.mrb[12].mxu1 %vm301_vm0, %v446_v19 }
 0x1cd   : > { %v1091_v22 = vpop.f32.mrb[0].mxu1 }
 0x1ce   : > { %v537_v23 = vadd.f32 %v1091_v22, %v1420_v21  ;;  %v528_v24 = vpop.f32.mrb[1].mxu1 }
 0x1cf   : > { %v529_v25 = vadd.f32 %v1420_v21, %v528_v24  ;;  %v1092_v26 = vpop.f32.mrb[2].mxu1 }
 0x1d0   : > { %v593_v28 = vmax.f32 %v537_v23, 0.0  ;;  %v540_v29 = vadd.f32 %v1092_v26, %v1420_v21  ;;  %v531_v30 = vpop.f32.mrb[3].mxu1 }
 0x1d1   : > { %v591_v31 = vmax.f32 %v529_v25, 0.0  ;;  %v532_v32 = vadd.f32 %v1420_v21, %v531_v30 }
 0x1d2   : > { %v594_v33 = vmax.f32 %v540_v29, 0.0  ;;  %v1432_v34 = vadd.f32 %v1427_v27, %v593_v28 }
 0x1d3   : > { %v592_v35 = vmax.f32 %v532_v32, 0.0  ;;  %v1435_v36 = vadd.f32 %v1427_v27, %v591_v31 }
 0x1d4   : > { %634 = vmax.xlane.f32.xlu1 %v1432_v34  ;;  %v1441_v40 = vadd.f32 %v1427_v27, %v594_v33 }
 0x1d5   : > { %v1095_v37 = vpop.f32.mrb[4].mxu1  ;;  %630 = vmax.xlane.f32.xlu0 %v1435_v36  ;;  %v1445_v43 = vadd.f32 %v1427_v27, %v592_v35 }
 0x1d6   : > { %v553_v38 = vadd.f32 %v1095_v37, %v1420_v21  ;;  %v544_v39 = vpop.f32.mrb[5].mxu1 }
 0x1d7   : > { %v545_v41 = vadd.f32 %v1420_v21, %v544_v39  ;;  %v1096_v42 = vpop.f32.mrb[6].mxu1 }
 0x1d8   : > { %v597_v44 = vmax.f32 %v553_v38, 0.0  ;;  %v556_v45 = vadd.f32 %v1096_v42, %v1420_v21  ;;  %636 = vmax.xlane.f32.xlu1 %v1441_v40  ;;  %v547_v46 = vpop.f32.mrb[7].mxu1 }
 0x1d9   : > { %v548_v47 = vadd.f32 %v1420_v21, %v547_v46  ;;  %632 = vmax.xlane.f32.xlu0 %v1445_v43  ;;  %v595_v50 = vmax.f32 %v545_v41, 0.0 }
 0x1da   : > { %v598_v48 = vmax.f32 %v556_v45, 0.0  ;;  %v1452_v49 = vadd.f32 %v1427_v27, %v597_v44 }
 0x1db   : > { %v596_v51 = vmax.f32 %v548_v47, 0.0  ;;  %v1462_v58 = vadd.f32 %v1427_v27, %v595_v50 }
 0x1dc   : > { %v1455_v52 = vadd.f32 %v1427_v27, %v598_v48 }
 0x1dd   : > { %v1099_v53 = vpop.f32.mrb[8].mxu1  ;;  %642 = vmax.xlane.f32.xlu0 %v1452_v49  ;;  %v1466_v62 = vadd.f32 %v1427_v27, %v596_v51 }
 0x1de   : > { %v569_v54 = vadd.f32 %v1099_v53, %v1420_v21  ;;  %644 = vmax.xlane.f32.xlu1 %v1455_v52  ;;  %v560_v55 = vpop.f32.mrb[9].mxu1 }
 0x1df   : > { %v561_v56 = vadd.f32 %v1420_v21, %v560_v55  ;;  %v1100_v57 = vpop.f32.mrb[10].mxu1 }
 0x1e0   : > { %v601_v59 = vmax.f32 %v569_v54, 0.0  ;;  %v572_v60 = vadd.f32 %v1100_v57, %v1420_v21  ;;  %v563_v61 = vpop.f32.mrb[11].mxu1 }
 0x1e1   : > { %v564_v63 = vadd.f32 %v1420_v21, %v563_v61  ;;  %638 = vmax.xlane.f32.xlu0 %v1462_v58  ;;  %v599_v2 = vmax.f32 %v561_v56, 0.0 }
 0x1e2   : > { %v602_v0 = vmax.f32 %v572_v60, 0.0  ;;  %640 = vmax.xlane.f32.xlu1 %v1466_v62  ;;  %v1472_v1 = vadd.f32 %v1427_v27, %v601_v59 }
 0x1e3   : > { %v600_v3 = vmax.f32 %v564_v63, 0.0  ;;  %v1482_v10 = vadd.f32 %v1427_v27, %v599_v2 }
 0x1e4   : > { %v1475_v4 = vadd.f32 %v1427_v27, %v602_v0 }
 0x1e5   : > { %v1103_v5 = vpop.f32.mrb[12].mxu1  ;;  %650 = vmax.xlane.f32.xlu0 %v1472_v1  ;;  %v1485_v12 = vadd.f32 %v1427_v27, %v600_v3 }
 0x1e6   : > { %v576_v6 = vpop.f32.mrb[13].mxu1  ;;  %652 = vmax.xlane.f32.xlu1 %v1475_v4  ;;  %v585_v7 = vadd.f32 %v1103_v5, %v1420_v21 }
 0x1e7   : > { %v577_v8 = vadd.f32 %v1420_v21, %v576_v6  ;;  %v1104_v9 = vpop.f32.mrb[14].mxu1 }
 0x1e8   : > { %v579_v11 = vpop.f32.mrb[15].mxu1  ;;  %v588_v14 = vadd.f32 %v1104_v9, %v1420_v21  ;;  %v605_v16 = vmax.f32 %v585_v7, 0.0 }
 0x1e9   : > { %v603_v13 = vmax.f32 %v577_v8, 0.0  ;;  %v580_v15 = vadd.f32 %v1420_v21, %v579_v11  ;;  %646 = vmax.xlane.f32.xlu0 %v1482_v10 }
 0x1ea   : > { %648 = vmax.xlane.f32.xlu1 %v1485_v12  ;;  %v606_v19 = vmax.f32 %v588_v14, 0.0  ;;  %v1500_v22 = vadd.f32 %v1427_v27, %v605_v16 }
 0x1eb   : > { %v604_v17 = vmax.f32 %v580_v15, 0.0  ;;  %v1492_v18 = vadd.f32 %v1427_v27, %v603_v13 }
 0x1ec   : > { %v1504_v21 = vadd.f32 %v1427_v27, %v606_v19 }
 0x1ed   : > { %654 = vmax.xlane.f32.xlu0 %v1492_v18  ;;  %v1496_v20 = vadd.f32 %v1427_v27, %v604_v17 }
 0x1ef   : > { %656 = vmax.xlane.f32.xlu1 %v1496_v20 }
 0x1f1   : > { %658 = vmax.xlane.f32.xlu0 %v1500_v22 }
 0x1f3   : > { %660 = vmax.xlane.f32.xlu1 %v1504_v21 }
 0x261   : > { %v635_v23 = vpop.xlane.xlu1 %634 }
 0x262   : > { %v664_v24 = vsub.f32 %v1432_v34, %v635_v23  ;;  %v631_v25 = vpop.xlane.xlu0 %630 }
 0x263   : > { %v662_v26 = vsub.f32 %v1435_v36, %v631_v25 }
 0x264   : > { %v682_v28 = vmul.f32 1.442695, %v664_v24 }
 0x265   : > { %v678_v29 = vmul.f32 1.442695, %v662_v26  ;;  %v637_v30 = vpop.xlane.xlu1 %636 }
 0x266   : > { %1150 = vpow2.f32 %v682_v28  ;;  %v665_v31 = vsub.f32 %v1441_v40, %v637_v30  ;;  %v633_v32 = vpop.xlane.xlu0 %632 }
 0x267   : > { %v663_v33 = vsub.f32 %v1445_v43, %v633_v32  ;;  %1152 = vpow2.f32 %v678_v29 }
 0x268   : > { %v684_v35 = vmul.f32 1.442695, %v665_v31 }
 0x269   : > { %v680_v27 = vmul.f32 1.442695, %v663_v33 }
 0x26a   : > { %1154 = vpow2.f32 %v684_v35  ;;  %v643_v37 = vpop.xlane.xlu0 %642 }
 0x26b   : > { %v668_v38 = vsub.f32 %v1452_v49, %v643_v37  ;;  %v645_v34 = vpop.xlane.xlu1 %644  ;;  %1156 = vpow2.f32 %v680_v27 }
 0x26c   : > { %v669_v39 = vsub.f32 %v1455_v52, %v645_v34 }
 0x26d   : > { %v690_v36 = vmul.f32 1.442695, %v668_v38 }
 0x26e   : > { %v692_v41 = vmul.f32 1.442695, %v669_v39  ;;  %v639_v42 = vpop.xlane.xlu0 %638 }
 0x26f   : > { %1158 = vpow2.f32 %v690_v36  ;;  %v666_v40 = vsub.f32 %v1462_v58, %v639_v42  ;;  %v641_v44 = vpop.xlane.xlu1 %640 }
 0x270   : > { %v1514_v45 = vpop.eup %1150  ;;  %v667_v43 = vsub.f32 %v1466_v62, %v641_v44  ;;  %1160 = vpow2.f32 %v692_v41 }
 0x271   : > { %v686_v46 = vmul.f32 1.442695, %v666_v40  ;;  %714 = vadd.xlane.f32.xlu0 %v1514_v45  ;;  %v1518_v49 = vpop.eup %1152 }
 0x272   : > { %v688_v47 = vmul.f32 1.442695, %v667_v43  ;;  %v651_v48 = vpop.xlane.xlu0 %650 }
 0x273   : > { %1162 = vpow2.f32 %v686_v46  ;;  %v672_v50 = vsub.f32 %v1472_v1, %v651_v48  ;;  %v653_v51 = vpop.xlane.xlu1 %652 }
 0x274   : > { %v1521_v52 = vpop.eup %1154  ;;  %v673_v53 = vsub.f32 %v1475_v4, %v653_v51  ;;  %1164 = vpow2.f32 %v688_v47 }
 0x275   : > { %v698_v54 = vmul.f32 1.442695, %v672_v50  ;;  %716 = vadd.xlane.f32.xlu1 %v1521_v52  ;;  %710 = vadd.xlane.f32.xlu0 %v1518_v49  ;;  %v1527_v59 = vpop.eup %1156 }
 0x276   : > { %v700_v55 = vmul.f32 1.442695, %v673_v53  ;;  %v647_v56 = vpop.xlane.xlu0 %646 }
 0x277   : > { %1166 = vpow2.f32 %v698_v54  ;;  %v670_v57 = vsub.f32 %v1482_v10, %v647_v56  ;;  %v649_v58 = vpop.xlane.xlu1 %648 }
 0x278   : > { %v671_v60 = vsub.f32 %v1485_v12, %v649_v58  ;;  %1168 = vpow2.f32 %v700_v55 }
 0x279   : > { %v1530_v61 = vpop.eup %1158  ;;  %v694_v62 = vmul.f32 1.442695, %v670_v57  ;;  %712 = vadd.xlane.f32.xlu1 %v1527_v59 }
 0x27a   : > { %v696_v63 = vmul.f32 1.442695, %v671_v60  ;;  %722 = vadd.xlane.f32.xlu0 %v1530_v61  ;;  %v655_v0 = vpop.xlane.xlu0 %654  ;;  %v1535_v2 = vpop.eup %1160 }
 0x27b   : > { %1170 = vpow2.f32 %v694_v62  ;;  %v674_v1 = vsub.f32 %v1492_v18, %v655_v0 }
 0x27c   : > { %v657_v3 = vpop.xlane.xlu1 %656  ;;  %1172 = vpow2.f32 %v696_v63 }
 0x27d   : > { %v1537_v4 = vpop.eup %1162  ;;  %v702_v5 = vmul.f32 1.442695, %v674_v1  ;;  %v675_v6 = vsub.f32 %v1496_v20, %v657_v3  ;;  %724 = vadd.xlane.f32.xlu1 %v1535_v2 }
 0x27e   : > { %718 = vadd.xlane.f32.xlu0 %v1537_v4  ;;  %v659_v7 = vpop.xlane.xlu0 %658  ;;  %v1543_v10 = vpop.eup %1164 }
 0x27f   : > { %1174 = vpow2.f32 %v702_v5  ;;  %v704_v8 = vmul.f32 1.442695, %v675_v6  ;;  %v676_v9 = vsub.f32 %v1500_v22, %v659_v7 }
 0x280   : > { %v661_v11 = vpop.xlane.xlu1 %660 }
 0x281   : > { %v1545_v12 = vpop.eup %1166  ;;  %1176 = vpow2.f32 %v704_v8  ;;  %v706_v13 = vmul.f32 1.442695, %v676_v9  ;;  %v677_v14 = vsub.f32 %v1504_v21, %v661_v11  ;;  %720 = vadd.xlane.f32.xlu1 %v1543_v10 }
 0x282   : > { %730 = vadd.xlane.f32.xlu0 %v1545_v12  ;;  %v1550_v16 = vpop.eup %1168 }
 0x283   : > { %1178 = vpow2.f32 %v706_v13  ;;  %v708_v15 = vmul.f32 1.442695, %v677_v14 }
 0x285   : > { %v1552_v17 = vpop.eup %1170  ;;  %1180 = vpow2.f32 %v708_v15  ;;  %732 = vadd.xlane.f32.xlu1 %v1550_v16 }
 0x286   : > { %726 = vadd.xlane.f32.xlu0 %v1552_v17  ;;  %v1556_v18 = vpop.eup %1172 }
 0x289   : > { %v1558_v19 = vpop.eup %1174  ;;  %728 = vadd.xlane.f32.xlu1 %v1556_v18 }
 0x28a   : > { %734 = vadd.xlane.f32.xlu0 %v1558_v19 }
 0x28b   : > { %v1562_v20 = vpop.eup %1176 }
 0x28d   : > { %v1564_v22 = vpop.eup %1178  ;;  %736 = vadd.xlane.f32.xlu1 %v1562_v20 }
 0x28e   : > { %738 = vadd.xlane.f32.xlu0 %v1564_v22 }
 0x28f   : > { %v1568_v21 = vpop.eup %1180 }
 0x291   : > { %740 = vadd.xlane.f32.xlu1 %v1568_v21 }
 0x2fe   : > { %v715_v23 = vpop.xlane.xlu0 %714 }
 0x2ff   : > { %1182 = vrcp.f32 %v715_v23 }
 0x302   : > { %v717_v24 = vpop.xlane.xlu1 %716  ;;  %v711_v25 = vpop.xlane.xlu0 %710 }
 0x303   : > { %1184 = vrcp.f32 %v717_v24 }
 0x304   : > { %1186 = vrcp.f32 %v711_v25 }
 0x306   : > { %v713_v26 = vpop.xlane.xlu1 %712 }
 0x307   : > { %1188 = vrcp.f32 %v713_v26  ;;  %v723_v28 = vpop.xlane.xlu0 %722 }
 0x308   : > { %1190 = vrcp.f32 %v723_v28 }
 0x309   : > { %v1183_v30 = vpop.eup %1182 }
 0x30a   : > { %v725_v29 = vpop.xlane.xlu1 %724  ;;  %v760_v33 = vmul.f32 %v1183_v30, %v1514_v45 }
 0x30b   : > { %1192 = vrcp.f32 %v725_v29  ;;  %v719_v31 = vpop.xlane.xlu0 %718 }
 0x30c   : > { %1194 = vrcp.f32 %v719_v31 }
 0x30d   : > { %v1185_v32 = vpop.eup %1184 }
 0x30e   : > { %v761_v35 = vmul.f32 %v1185_v32, %v1521_v52  ;;  %v721_v27 = vpop.xlane.xlu1 %720  ;;  %v1187_v37 = vpop.eup %1186 }
 0x30f   : > { %1196 = vrcp.f32 %v721_v27  ;;  %v731_v38 = vpop.xlane.xlu0 %730  ;;  %v758_v36 = vmul.f32 %v1187_v37, %v1518_v49 }
 0x310   : > { %v1006_v34 = vpack.c.bf16 %v761_v35, %v760_v33  ;;  %1198 = vrcp.f32 %v731_v38 }
 0x311   : > { %v1189_v39 = vpop.eup %1188 }
 0x312   : > { %1038 = vst [vmem:[%s1576_s15 + $0x8] sm:$0xff] %v1006_v34   ;;  %v759_v41 = vmul.f32 %v1189_v39, %v1527_v59  ;;  %v733_v42 = vpop.xlane.xlu1 %732  ;;  %v1191_v40 = vpop.eup %1190 }
 0x313   : > { %1200 = vrcp.f32 %v733_v42  ;;  %v727_v44 = vpop.xlane.xlu0 %726  ;;  %v764_v46 = vmul.f32 %v1191_v40, %v1530_v61 }
 0x314   : > { %v1001_v45 = vpack.c.bf16 %v759_v41, %v758_v36  ;;  %1202 = vrcp.f32 %v727_v44 }
 0x315   : > { %v1193_v43 = vpop.eup %1192 }
 0x316   : > { %1002 = vst [vmem:[%s1576_s15] sm:$0xff] %v1001_v45   ;;  %v765_v47 = vmul.f32 %v1193_v43, %v1535_v2  ;;  %v729_v48 = vpop.xlane.xlu1 %728  ;;  %v1195_v50 = vpop.eup %1194 }
 0x317   : > { %1204 = vrcp.f32 %v729_v48  ;;  %v735_v49 = vpop.xlane.xlu0 %734  ;;  %v762_v53 = vmul.f32 %v1195_v50, %v1537_v4 }
 0x318   : > { %v1016_v51 = vpack.c.bf16 %v765_v47, %v764_v46  ;;  %1206 = vrcp.f32 %v735_v49 }
 0x319   : > { %v1197_v52 = vpop.eup %1196 }
 0x31a   : > { %1040 = vst [vmem:[%s1576_s15 + $0x18] sm:$0xff] %v1016_v51   ;;  %v763_v54 = vmul.f32 %v1197_v52, %v1543_v10  ;;  %v737_v55 = vpop.xlane.xlu1 %736  ;;  %v1199_v56 = vpop.eup %1198 }
 0x31b   : > { %1208 = vrcp.f32 %v737_v55  ;;  %v739_v57 = vpop.xlane.xlu0 %738  ;;  %v768_v60 = vmul.f32 %v1199_v56, %v1545_v12 }
 0x31c   : > { %v1011_v58 = vpack.c.bf16 %v763_v54, %v762_v53  ;;  %1210 = vrcp.f32 %v739_v57 }
 0x31d   : > { %v1201_v59 = vpop.eup %1200 }
 0x31e   : > { %1039 = vst [vmem:[%s1576_s15 + $0x10] sm:$0xff] %v1011_v58   ;;  %v769_v61 = vmul.f32 %v1201_v59, %v1550_v16  ;;  %v741_v62 = vpop.xlane.xlu1 %740  ;;  %v1203_v63 = vpop.eup %1202 }
 0x31f   : > { %1212 = vrcp.f32 %v741_v62  ;;  %v766_v2 = vmul.f32 %v1203_v63, %v1552_v17 }
 0x320   : > { %v1026_v0 = vpack.c.bf16 %v769_v61, %v768_v60 }
 0x321   : > { %v1205_v1 = vpop.eup %1204 }
 0x322   : > { %1042 = vst [vmem:[%s1576_s15 + $0x28] sm:$0xff] %v1026_v0   ;;  %v767_v3 = vmul.f32 %v1205_v1, %v1556_v18  ;;  %v1207_v4 = vpop.eup %1206 }
 0x323   : > { %v770_v7 = vmul.f32 %v1207_v4, %v1558_v19 }
 0x324   : > { %v1021_v5 = vpack.c.bf16 %v767_v3, %v766_v2 }
 0x325   : > { %v1209_v6 = vpop.eup %1208 }
 0x326   : > { %1041 = vst [vmem:[%s1576_s15 + $0x20] sm:$0xff] %v1021_v5   ;;  %v771_v8 = vmul.f32 %v1209_v6, %v1562_v20  ;;  %v1211_v9 = vpop.eup %1210 }
 0x327   : > { %v772_v12 = vmul.f32 %v1211_v9, %v1564_v22 }
 0x328   : > { %v1031_v10 = vpack.c.bf16 %v771_v8, %v770_v7 }
 0x329   : > { %v1213_v11 = vpop.eup %1212 }
 0x32a   : > { %1043 = vst [vmem:[%s1576_s15 + $0x30] sm:$0xff] %v1031_v10   ;;  %v773_v13 = vmul.f32 %v1213_v11, %v1568_v21 }
 0x32c   : > { %v1036_v14 = vpack.c.bf16 %v773_v13, %v772_v12 }
 0x32e   : > { %1044 = vst [vmem:[%s1576_s15 + $0x38] sm:$0xff] %v1036_v14  }
 0x32f   : > { %1227 = shalt.err (!%p1224_p3)
}
 0x330   : > { %s1228_s10 = scalar_lea.hbm %s1604_s20, 1024  ;;  %s1232_s13 = scalar_lea.hbm %s1658_s6, 2048 }
 0x331   : > { %p1229_p4 = scmp.ne.s32.totalorder %s1604_s20, %s1228_s10  ;;  %p1233_p9 = scmp.lt.u32.totalorder %s1604_s20, %s1658_s6 }
 0x332   : > { %p1234_p10 = scmp.lt.u32.totalorder %s1232_s13, %s1228_s10  ;;  %p1236_p12 = scmp.lt.u32.totalorder %s1228_s10, %s1604_s20 }
 0x333   : > { %p1230_p7 = pnand %p1229_p4, %p1354_p5 }
 0x334   : > { %p1235_p11 = por %p1234_p10, %p1233_p9 }
 0x335   : > { %p1231_p8 = pneg %p1230_p7 }
 0x336   : > { %p1237_p13 = por %p1236_p12, %p1235_p11 }
 0x338   : > { %p1238_p0 = pnand %p1237_p13, %p1231_p8 }
 0x33a   : > { %1241 = shalt.err (!%p1238_p0)
}
 0x33b   : > { %s1279_s16 = smov 64   ;;  %s1280_s18 = smov 4  }
 0x33c   : > { %1105 = dma.vmem_to_hbm [thread:$0]  (%p1354_p5), %s1606_s17, 1024, %s1604_s20, %s1611_s25, %s1279_s16, %s1279_s16, %s1280_s18  }
 0x33d PF: > { %p1111_p1 = scmp.ge.s32.totalorder %s1276_s24, 2  ;;  %s883_s19 = sand.u32 1, %s1264_s21  }
 0x33e   : > { %s884_s26 = scalar_lea.sflag [#allocation3], %s883_s19 }
 0x33f   : > { %p1108_p2 = pnand %p1111_p1, %p1358_p6 }
 0x341   : > { %1259 = dma.done.wait (!%p1108_p2), %s884_s26, 1024  }
 0x342   : > { %1261 = vsyncadd (!%p1108_p2), %s884_s26, 4294966272  ;;  %p16_p3 = scmp.ge.s32.totalorder %s1341_s27, 4   ;;  %s1661_s21 = smov %s1268_s22 }
 0x343   : > { %s1662_s22 = smov %s1272_s23  ;;  %s1663_s23 = smov %s1352_s30 }
 0x344   : > { %s1664_s24 = smov %s1341_s27  ;;  %18 = sbr.rel (!%p16_p3) target bundleno = 3 (0x3), region = 79 }
 0x34b   :  { %889 = vsyncpa [#allocation3], 1 }
 0x34c   :  { %891 = vsyncpa [#allocation3 + $0x1], 1 }

</bundles_post_ra>
